<compile_context>
chip_gen: v5e
topology: v5e:2x2
jax: 0.10.0
libtpu: 0.0.40
codegen_flags: <defaults>
</compile_context>

<pallas_src>
import functools

import jax
import jax.numpy as jnp
from jax.experimental import pallas as pl
from jax.experimental.pallas import tpu as pltpu


def _round_up(a, b):
    return (a + b - 1) // b * b


# --------------------------------- kernel -------------------------------------
def _segment_pool_kernel(two_stream, needs_mask, n_nodes, tile, tiles_per_core,
                         g_pad, bid_ref, *refs):
    """Accumulate per-graph feature sums (and node counts) over node tiles."""
    if two_stream:
        x0_ref, x1_ref, out0_ref, out1_ref, cnt_ref = refs
    else:
        x0_ref, out0_ref, cnt_ref = refs
        x1_ref = out1_ref = None

    t = pl.program_id(1)            # node-tile axis ("arbitrary" -> outputs stay resident)

    @pl.when(t == 0)
    def _init():
        out0_ref[...] = jnp.zeros_like(out0_ref)
        cnt_ref[...] = jnp.zeros_like(cnt_ref)
        if two_stream:
            out1_ref[...] = jnp.zeros_like(out1_ref)

    seg = bid_ref[...]                                           # [1, tile] int32 (lane-dense)
    giota = jax.lax.broadcasted_iota(jnp.int32, (g_pad, 1), 0)   # [g_pad, 1] (tiny)
    onehot = giota == seg                                        # broadcast -> [g_pad, tile]
    onehot_f32 = onehot.astype(jnp.float32)

    # per-graph node counts ride the XLU row-reduce (free slots) -> no wrapper scatter
    cnt_ref[...] += jnp.sum(onehot_f32, axis=-1, keepdims=True)

    x_dtype = x0_ref.dtype
    onehot_x = onehot_f32 if x_dtype == jnp.float32 else onehot.astype(x_dtype)

    row_valid = None
    if needs_mask:
        base = (pl.program_id(0) * tiles_per_core + t) * tile
        row = base + jax.lax.broadcasted_iota(jnp.int32, (tile, 1), 0)
        row_valid = row < n_nodes                                # [tile, 1]

    def _load(ref):
        x = ref[...]
        if needs_mask:
            # zero out-of-range rows so garbage (possibly NaN/Inf) never hits the MXU
            x = jnp.where(row_valid, x, jnp.zeros_like(x))
        return x

    out0_ref[...] += jnp.dot(onehot_x, _load(x0_ref),
                             preferred_element_type=jnp.float32)
    if two_stream:
        out1_ref[...] += jnp.dot(onehot_x, _load(x1_ref),
                                 preferred_element_type=jnp.float32)


# ------------------------------ planning helpers -------------------------------
def _plan_tiling(n_nodes, hid_dim, itemsize, num_cores, g_pad, tile_n=None):
    """Pick (cores, tile, tiles_per_core) honoring the (8,128) block constraints."""
    cores = num_cores if (num_cores > 1 and n_nodes >= 2048) else 1

    if tile_n is None:
        # ~1.5 MiB per stream block DMA (memory-bound; per-grid-step overhead ~0.35us)
        target = (3 << 20) // 2
        tile = _round_up(max(128, target // max(hid_dim * itemsize, 1)), 128)
        tile = max(512, min(tile, 8192))
        # keep per-tile one-hot working set modest (TODO(synk): graph-window path)
        cap = max(128, (((8 << 20) // (4 * g_pad)) // 128) * 128)
        tile = min(tile, cap)
    else:
        tile = max(128, _round_up(tile_n, 128))

    per_core = -(-n_nodes // cores)
    if tile >= per_core:
        # single tile per core; multi-core needs 128-dense bid blocks
        tile = _round_up(per_core, 8 if cores == 1 else 128)
        tiles_per_core = 1
    else:
        tiles_per_core = -(-per_core // tile)
    return cores, tile, tiles_per_core


def _vmem_budget(tile, hid_dim, itemsize, streams, g_pad, buffer_count):
    """Scoped-VMEM limit from the real footprint, clamped to the device's capacity."""
    buf = max(2, buffer_count)
    in_bytes = streams * buf * tile * hid_dim * itemsize
    bid_bytes = buf * tile * 4
    out_bytes = 2 * (streams * g_pad * max(hid_dim, 128) * 4 + g_pad * 128 * 4)
    onehot_bytes = 2 * g_pad * tile * max(itemsize, 4)
    need = in_bytes + bid_bytes + out_bytes + onehot_bytes + (4 << 20)
    try:
        phys = int(pltpu.get_tpu_info().vmem_capacity_bytes)
    except Exception:  # pragma: no cover - conservative fallback (v7x per-TC floor)
        phys = 64 << 20
    return int(min(phys * 3 // 4, max(need, 16 << 20)))


# --------------------------------- wrapper -------------------------------------
def fuse_base_forward(x0, x1, batch_ids, weight, bias, num_graphs,
                      reduce_fuse='concat', reduce_nodes='mean',
                      tile_n=None, num_cores=1, input_buffer_count=2):
    """FuseBase.forward_fuse_embed with identity `net`.

    x0, x1      : [N, hid_dim] node embeddings of the two branches.  Pass x1=None for
                  the single-stream fast path (the actual fuse_embed identity-net case).
    batch_ids   : [N] int32 node -> graph assignment (values in [0, num_graphs)).
    weight      : [nclass, hid_dim * (2 if concat else 1)]  (PyTorch Linear layout)
    bias        : [nclass]
    returns     : [num_graphs, nclass] float32
    """
    assert reduce_fuse in ('mean', 'concat', 'sum')
    assert reduce_nodes in ('mean', 'sum')

    n_nodes, hid_dim = x0.shape
    itemsize = x0.dtype.itemsize
    two_stream = x1 is not None          # explicit: None => single stream (no `is` aliasing)
    streams = 2 if two_stream else 1

    # --- effective output weights encode the fuse mode --------------------------
    w_t = weight.T.astype(jnp.float32)                       # [D_in, nclass]
    if reduce_fuse == 'concat':
        assert w_t.shape[0] == 2 * hid_dim
        wa, wb = w_t[:hid_dim], w_t[hid_dim:]
    elif reduce_fuse == 'mean':
        assert w_t.shape[0] == hid_dim
        wa = wb = 0.5 * w_t
    else:  # 'sum'
        assert w_t.shape[0] == hid_dim
        wa = wb = w_t
    bias_f32 = bias.astype(jnp.float32)

    # --- tiling (node features are NOT copied/padded; only batch_ids is) --------
    g_mult = 16 if itemsize < 4 else 8            # bf16 one-hot -> 16-row sublane packing
    g_pad = max(g_mult, _round_up(num_graphs, g_mult))
    cores, tile, tiles_per_core = _plan_tiling(n_nodes, hid_dim, itemsize,
                                               num_cores, g_pad, tile_n)
    n_bid_pad = cores * tiles_per_core * tile
    needs_mask = n_bid_pad > n_nodes

    bids = batch_ids.astype(jnp.int32)
    if n_bid_pad > n_nodes:
        bids = jnp.pad(bids, (0, n_bid_pad - n_nodes), constant_values=-1)
    bids2 = bids.reshape(1, n_bid_pad)

    # --- block specs -------------------------------------------------------------
    bid_map = lambda c, t: (0, c * tiles_per_core + t)
    x_map = lambda c, t: (c * tiles_per_core + t, 0)
    out_map = lambda c, t: (c, 0, 0)

    def _x_spec():
        if input_buffer_count and input_buffer_count > 2:
            try:   # deeper input pipelining (v7x tuning knob)
                return pl.BlockSpec((tile, hid_dim), x_map,
                                    pipeline_mode=pl.Buffered(input_buffer_count))
            except TypeError:
                pass
        return pl.BlockSpec((tile, hid_dim), x_map)

    bid_spec = pl.BlockSpec((1, tile), bid_map)
    x_spec = _x_spec()
    out_spec = pl.BlockSpec((None, g_pad, hid_dim), out_map)
    cnt_spec = pl.BlockSpec((None, g_pad, 1), out_map)

    out_sds = jax.ShapeDtypeStruct((cores, g_pad, hid_dim), jnp.float32)
    cnt_sds = jax.ShapeDtypeStruct((cores, g_pad, 1), jnp.float32)

    if two_stream:
        in_specs = [bid_spec, x_spec, x_spec]
        out_specs = [out_spec, out_spec, cnt_spec]
        out_shape = (out_sds, out_sds, cnt_sds)
        call_args = (bids2, x0, x1)
    else:
        in_specs = [bid_spec, x_spec]
        out_specs = [out_spec, cnt_spec]
        out_shape = (out_sds, cnt_sds)
        call_args = (bids2, x0)

    kernel = functools.partial(_segment_pool_kernel, two_stream, needs_mask,
                               n_nodes, tile, tiles_per_core, g_pad)
    vmem_limit = _vmem_budget(tile, hid_dim, itemsize, streams, g_pad,
                              input_buffer_count)

    result = pl.pallas_call(
        kernel,
        out_shape=out_shape,
        grid_spec=pltpu.PrefetchScalarGridSpec(
            num_scalar_prefetch=0,
            grid=(cores, tiles_per_core),
            in_specs=in_specs,
            out_specs=out_specs,
        ),
        compiler_params=pltpu.CompilerParams(
            dimension_semantics=("parallel", "arbitrary"),
            vmem_limit_bytes=vmem_limit,
        ),
    )(*call_args)

    # --- tiny per-graph finish (combine cores, project, bias, mean) -------------
    if two_stream:
        p0 = result[0].sum(axis=0)[:num_graphs]               # [G, hid]
        p1 = result[1].sum(axis=0)[:num_graphs]
        cnt = result[2].sum(axis=0)[:num_graphs, 0]           # [G]
        proj = p0 @ wa + p1 @ wb                               # [G, nclass]
    else:
        p0 = result[0].sum(axis=0)[:num_graphs]
        cnt = result[1].sum(axis=0)[:num_graphs, 0]
        proj = p0 @ (wa + wb)

    if reduce_nodes == 'mean':
        nonempty = (cnt > 0).astype(jnp.float32)[:, None]
        return proj / jnp.maximum(cnt, 1.0)[:, None] + bias_f32[None, :] * nonempty
    return proj + bias_f32[None, :] * cnt[:, None]


# ------------------------------- reference ------------------------------------
def _reference(x0, x1, batch_ids, weight, bias, num_graphs, reduce_fuse, reduce_nodes):
    if reduce_fuse == 'mean':
        xf = (x0 + x1) * 0.5
    elif reduce_fuse == 'sum':
        xf = x0 + x1
    else:  # concat
        xf = jnp.concatenate([x0, x1], axis=-1)
    y = xf @ weight.T + bias
    seg_sum = jnp.zeros((num_graphs, y.shape[-1]), jnp.float32).at[batch_ids].add(y)
    if reduce_nodes == 'mean':
        cnt = jnp.zeros((num_graphs,), jnp.float32).at[batch_ids].add(1.0)
        return seg_sum / jnp.maximum(cnt, 1.0)[:, None]
    return seg_sum


if __name__ == "__main__":
    master = jax.random.PRNGKey(0)

    def run_case(key, n_nodes, hid_dim, nclass, num_graphs,
                 reduce_fuse, reduce_nodes, two_stream, **kw):
        k1, k2, k3, k4, k5 = jax.random.split(key, 5)
        x0 = jax.random.normal(k1, (n_nodes, hid_dim), jnp.float32)
        x1 = (jax.random.normal(k2, (n_nodes, hid_dim), jnp.float32)
              if two_stream else x0)
        d_in = hid_dim * 2 if reduce_fuse == 'concat' else hid_dim
        w = jax.random.normal(k3, (nclass, d_in), jnp.float32) * 0.1
        b = jax.random.normal(k4, (nclass,), jnp.float32) * 0.1
        batch_ids = jnp.sort(
            jax.random.randint(k5, (n_nodes,), 0, num_graphs)).astype(jnp.int32)

        out = fuse_base_forward(x0, x1 if two_stream else None, batch_ids, w, b,
                                num_graphs, reduce_fuse=reduce_fuse,
                                reduce_nodes=reduce_nodes, **kw)
        out = jax.block_until_ready(out)

        ref = _reference(x0, x1, batch_ids, w, b, num_graphs,
                         reduce_fuse, reduce_nodes)
        assert out.shape == (num_graphs, nclass)
        rel = float(jnp.max(jnp.abs(out - ref)) / (jnp.max(jnp.abs(ref)) + 1e-6))
        assert rel < 2e-2, f"max relative error {rel}"

    keys = jax.random.split(master, 4)
    # 1) canonical fuse_embed case (identity net => single stream), concat + mean pooling
    run_case(keys[0], n_nodes=64, hid_dim=32, nclass=8, num_graphs=4,
             reduce_fuse='concat', reduce_nodes='mean', two_stream=False)
    # 2) two distinct branch embeddings, sum fuse + sum pooling
    run_case(keys[1], n_nodes=64, hid_dim=32, nclass=8, num_graphs=4,
             reduce_fuse='sum', reduce_nodes='sum', two_stream=True)
    # 3) multi-tile, ragged (masked) node axis, two streams
    run_case(keys[2], n_nodes=600, hid_dim=32, nclass=8, num_graphs=5,
             reduce_fuse='concat', reduce_nodes='mean', two_stream=True, tile_n=128)
    # 4) multi-core split (v7x-style), auto tile sizing, single stream
    run_case(keys[3], n_nodes=4096, hid_dim=32, nclass=8, num_graphs=16,
             reduce_fuse='mean', reduce_nodes='sum', two_stream=False, num_cores=2)

    print("KERNEL_OK")
</pallas_src>

<mosaic_0001>
module attributes {stable_mosaic.version = 11 : i64} {
  func.func @_segment_pool_kernel(%arg0: i32, %arg1: i32, %arg2: memref<1x64xi32, #tpu.memory_space<vmem>>, %arg3: memref<64x32xf32, #tpu.memory_space<vmem>>, %arg4: memref<1x8x32xf32, #tpu.memory_space<vmem>>, %arg5: memref<1x8x1xf32, #tpu.memory_space<vmem>>) attributes {dimension_semantics = [#tpu.dimension_semantics<parallel>, #tpu.dimension_semantics<arbitrary>], iteration_bounds = array<i64: 1, 1>, scalar_prefetch = 0 : i64, scratch_operands = 0 : i64, tpu.core_type = #tpu.core_type<tc>, window_params = [{transform_indices = @transform_0, window_bounds = array<i64: 1, 64>}, {transform_indices = @transform_1, window_bounds = array<i64: 64, 32>}, {transform_indices = @transform_2, window_bounds = array<i64: 1, 8, 32>}, {transform_indices = @transform_3, window_bounds = array<i64: 1, 8, 1>}]} {
    %c0_i32 = arith.constant 0 : i32
    %0 = arith.cmpi eq, %arg1, %c0_i32 : i32
    %1 = arith.extui %0 : i1 to i32
    %c0_i32_0 = arith.constant 0 : i32
    %2 = arith.cmpi ne, %1, %c0_i32_0 : i32
    scf.if %2 {
      %cst_17 = arith.constant 0.000000e+00 : f32
      %26 = vector.broadcast %cst_17 : f32 to vector<8x32xf32>
      %c0_18 = arith.constant 0 : index
      %c0_19 = arith.constant 0 : index
      %c0_20 = arith.constant 0 : index
      %27 = vector.load %arg4[%c0_18, %c0_19, %c0_20] : memref<1x8x32xf32, #tpu.memory_space<vmem>>, vector<1x8x32xf32>
      %28 = vector.shape_cast %27 : vector<1x8x32xf32> to vector<8x32xf32>
      %29 = vector.shape_cast %26 : vector<8x32xf32> to vector<1x8x32xf32>
      tpu.vector_store %arg4[%c0_18, %c0_19, %c0_20], %29 {strides = array<i32>} : memref<1x8x32xf32, #tpu.memory_space<vmem>>, vector<1x8x32xf32>,
      %cst_21 = arith.constant 0.000000e+00 : f32
      %30 = vector.broadcast %cst_21 : f32 to vector<8x1xf32>
      %c0_22 = arith.constant 0 : index
      %c0_23 = arith.constant 0 : index
      %c0_24 = arith.constant 0 : index
      %31 = vector.load %arg5[%c0_22, %c0_23, %c0_24] : memref<1x8x1xf32, #tpu.memory_space<vmem>>, vector<1x8x1xf32>
      %32 = vector.shape_cast %31 : vector<1x8x1xf32> to vector<8x1xf32>
      %33 = vector.shape_cast %30 : vector<8x1xf32> to vector<1x8x1xf32>
      tpu.vector_store %arg5[%c0_22, %c0_23, %c0_24], %33 {strides = array<i32>} : memref<1x8x1xf32, #tpu.memory_space<vmem>>, vector<1x8x1xf32>,
    } else {
    }
    %c0 = arith.constant 0 : index
    %c0_1 = arith.constant 0 : index
    %3 = vector.load %arg2[%c0, %c0_1] : memref<1x64xi32, #tpu.memory_space<vmem>>, vector<1x64xi32>
    %4 = tpu.iota {dimensions = array<i32: 0>} : vector<8x1xi32>
    %5 = vector.broadcast %4 : vector<8x1xi32> to vector<8x64xi32>
    %6 = vector.broadcast %3 : vector<1x64xi32> to vector<8x64xi32>
    %7 = arith.cmpi eq, %5, %6 : vector<8x64xi32>
    %8 = arith.extui %7 : vector<8x64xi1> to vector<8x64xi32>
    %9 = arith.sitofp %8 : vector<8x64xi32> to vector<8x64xf32>
    %c0_2 = arith.constant 0 : index
    %c0_3 = arith.constant 0 : index
    %c0_4 = arith.constant 0 : index
    %10 = vector.load %arg5[%c0_2, %c0_3, %c0_4] : memref<1x8x1xf32, #tpu.memory_space<vmem>>, vector<1x8x1xf32>
    %11 = vector.shape_cast %10 : vector<1x8x1xf32> to vector<8x1xf32>
    %cst = arith.constant dense<0.000000e+00> : vector<8xf32>
    %12 = vector.multi_reduction <add>, %9, %cst [1] : vector<8x64xf32> to vector<8xf32>
    %13 = vector.shape_cast %12 : vector<8xf32> to vector<8x1xf32>
    %14 = arith.addf %11, %13 : vector<8x1xf32>
    %c0_5 = arith.constant 0 : index
    %c0_6 = arith.constant 0 : index
    %c0_7 = arith.constant 0 : index
    %15 = vector.load %arg5[%c0_5, %c0_6, %c0_7] : memref<1x8x1xf32, #tpu.memory_space<vmem>>, vector<1x8x1xf32>
    %16 = vector.shape_cast %15 : vector<1x8x1xf32> to vector<8x1xf32>
    %17 = vector.shape_cast %14 : vector<8x1xf32> to vector<1x8x1xf32>
    tpu.vector_store %arg5[%c0_5, %c0_6, %c0_7], %17 {strides = array<i32>} : memref<1x8x1xf32, #tpu.memory_space<vmem>>, vector<1x8x1xf32>,
    %c0_8 = arith.constant 0 : index
    %c0_9 = arith.constant 0 : index
    %c0_10 = arith.constant 0 : index
    %18 = vector.load %arg4[%c0_8, %c0_9, %c0_10] : memref<1x8x32xf32, #tpu.memory_space<vmem>>, vector<1x8x32xf32>
    %19 = vector.shape_cast %18 : vector<1x8x32xf32> to vector<8x32xf32>
    %c0_11 = arith.constant 0 : index
    %c0_12 = arith.constant 0 : index
    %20 = vector.load %arg3[%c0_11, %c0_12] : memref<64x32xf32, #tpu.memory_space<vmem>>, vector<64x32xf32>
    %cst_13 = arith.constant dense<0.000000e+00> : vector<8x32xf32>
    %21 = tpu.matmul %9, %20, %cst_13 {dimension_numbers = #tpu.dot_dimension_numbers<[1], [0], [0], [1], [0, 0, 1, 1], [], []>} : vector<8x64xf32>, vector<64x32xf32>, vector<8x32xf32> -> vector<8x32xf32>
    %22 = arith.addf %19, %21 : vector<8x32xf32>
    %c0_14 = arith.constant 0 : index
    %c0_15 = arith.constant 0 : index
    %c0_16 = arith.constant 0 : index
    %23 = vector.load %arg4[%c0_14, %c0_15, %c0_16] : memref<1x8x32xf32, #tpu.memory_space<vmem>>, vector<1x8x32xf32>
    %24 = vector.shape_cast %23 : vector<1x8x32xf32> to vector<8x32xf32>
    %25 = vector.shape_cast %22 : vector<8x32xf32> to vector<1x8x32xf32>
    tpu.vector_store %arg4[%c0_14, %c0_15, %c0_16], %25 {strides = array<i32>} : memref<1x8x32xf32, #tpu.memory_space<vmem>>, vector<1x8x32xf32>,
    return
  }
  func.func @transform_0(%arg0: i32, %arg1: i32) -> (i32, i32) {
    %c1_i32 = arith.constant 1 : i32
    %0 = arith.muli %arg0, %c1_i32 : i32
    %1 = arith.addi %0, %arg1 : i32
    %c0_i32 = arith.constant 0 : i32
    %c0_i32_0 = arith.constant 0 : i32
    return %c0_i32, %1 : i32, i32
  }
  func.func @transform_1(%arg0: i32, %arg1: i32) -> (i32, i32) {
    %c1_i32 = arith.constant 1 : i32
    %0 = arith.muli %arg0, %c1_i32 : i32
    %1 = arith.addi %0, %arg1 : i32
    %c0_i32 = arith.constant 0 : i32
    %c0_i32_0 = arith.constant 0 : i32
    return %1, %c0_i32 : i32, i32
  }
  func.func @transform_2(%arg0: i32, %arg1: i32) -> (i32, i32, i32) {
    %c0_i32 = arith.constant 0 : i32
    %c0_i32_0 = arith.constant 0 : i32
    %c0_i32_1 = arith.constant 0 : i32
    return %arg0, %c0_i32, %c0_i32_0 : i32, i32, i32
  }
  func.func @transform_3(%arg0: i32, %arg1: i32) -> (i32, i32, i32) {
    %c0_i32 = arith.constant 0 : i32
    %c0_i32_0 = arith.constant 0 : i32
    %c0_i32_1 = arith.constant 0 : i32
    return %arg0, %c0_i32, %c0_i32_0 : i32, i32, i32
  }
}

</mosaic_0001>

<bundles_post_ra>
// kernel: tpu_custom_call.1
= control target key start
LH: loop header
LB: loop body
LE: loop exit
PB: predicated region body
PF: predicated region fallthrough
CT: control target
= control target key end

     0   :  { %vm54_vm0 = vcmask 261120   ;;  %vm56_vm1 = vcmask 7168   ;;  %v59_v2 = vlaneseq  ;;  %v168_v3 = vmov 0.0   ;;  %s233_s0 = inlined_call_operand.vmem [shape: s32[1,64], index: 0, kind: input, shape index: {}]   ;;  %s234_s1 = inlined_call_operand.vmem [shape: f32[64,32], index: 1, kind: input, shape index: {}]   ;;  %s235_s2 = inlined_call_operand.hbm [shape: f32[1,8,32], index: 2, kind: output, shape index: {0}]   ;;  %s236_s3 = inlined_call_operand.vmem [shape: f32[1,8,1], index: 3, kind: output, shape index: {1}]  }
   0x1   :  { %v81_v0 = vld [vmem:[%s234_s1 + $0x38] sm:$0xff]  ;;  %v80_v1 = vld [vmem:[%s234_s1 + $0x30] sm:$0xff]  ;;  %55 = vst.msk [vmem:[#allocation2] sm:$0xff] %vm54_vm0, %v168_v3  ;;  %v79_v4 = vld [vmem:[%s234_s1 + $0x28] sm:$0xff] }
   0x2   :  { %93 = vmatpush.msra.mxu0 %v81_v0  ;;  %57 = vst.msk [vmem:[%s236_s3] sm:$0xff] %vm56_vm1, %v168_v3  ;;  %v60_v5 = vshrl.u32 %v59_v2, 7  ;;  %v141_v6 = vld [vmem:[%s233_s0] ss:$0 sm:$0xff] }
   0x4   :  { %94 = vmatpush.msra.mxu0 %v80_v1 }
   0x5   :  { %9 = vsyncpa [#allocation3], 0  ;;  %v78_v7 = vld [vmem:[%s234_s1 + $0x20] sm:$0xff]  ;;  %vm62_vm2 = vcmp.eq.s32.totalorder %v60_v5, %v141_v6  ;;  %v77_v8 = vld [vmem:[%s234_s1 + $0x18] sm:$0xff]  ;;  %vm66_vm3 = vcmask 523264   ;;  %s169_s8 = smov [#allocation2]  }
   0x6   :  { %95 = vmatpush.msra.mxu0 %v79_v4  ;;  %v137_v9 = vsel %vm62_vm2, 1.0, %v168_v3  ;;  %v76_v11 = vld [vmem:[%s234_s1 + $0x10] sm:$0xff]  ;;  %v75_v12 = vld [vmem:[%s234_s1 + $0x8] sm:$0xff]  ;;  %v74_v13 = vld [vmem:[%s234_s1] sm:$0xff]  ;;  %s113_s9 = sshll.u32 %s169_s8, 4  ;;  %s115_s1 = sshll.u32 %s235_s2, 4  ;;  %s114_s9 = int_to_ptr.vmem [resolvable:$true] %s113_s9  ;;  %s116_s1 = int_to_ptr.hbm [resolvable:$true] %s115_s1 }
   0x7   :  { %v67_v10 = vsel %vm66_vm3, %v137_v9, 0.0 }
   0x8   :  { %96 = vmatpush.msra.mxu0 %v78_v7  ;;  %68 = vadd.xlane.f32.xlu0 %v67_v10  ;;  %v73_v17 = vld [vmem:[#allocation2] sm:$0xff] }
   0x9   :  { %v65_v14 = vld [vmem:[%s236_s3] sm:$0xff] }
   0xa   :  { %97 = vmatpush.msra.mxu0 %v77_v8 }
   0xc   :  { %98 = vmatpush.msra.mxu0 %v76_v11 }
   0xe   :  { %99 = vmatpush.msra.mxu0 %v75_v12 }
  0x10   :  { %100 = vmatpush.msra.mxu0 %v74_v13 }
  0x11   :  { %138 = vmatmul.msk.f32.vlgmr.msra.gmra.mxu0 %vm66_vm3, %v137_v9 }
  0x7b   :  { %v69_v15 = vpop.xlane.xlu0 %68 }
  0x7c   :  { %v70_v16 = vadd.f32 %v69_v15, %v65_v14 }
  0x7e   :  { %72 = vst.msk [vmem:[%s236_s3] sm:$0xff] %vm56_vm1, %v70_v16 }
  0x8e   :  { %v102_v18 = vpop.f32.mrf.mxu0 }
  0x8f   :  { %v105_v19 = vadd.f32 %v102_v18, %v73_v17 }
  0x91   :  { %107 = vst.msk [vmem:[#allocation2] sm:$0xff] %vm54_vm0, %v105_v19 }
  0x92   :  { %118 = dma.vmem_to_hbm [thread:$0]  %s114_s9, 128, %s116_s1, [#allocation3]  }
  0x93   :  { %166 = dma.done.wait [#allocation3], 128  }
  0x94   :  { %167 = vsyncadd [#allocation3], 4294967168 }
  0x95   :  { %127 = vsyncpa [#allocation3], 1 }

</bundles_post_ra>
